<compile_context>
chip_gen: v7x
topology: tpu7x:2x2x1
jax: 0.10.0
libtpu: 0.0.40
codegen_flags: <defaults>
</compile_context>

<pallas_src>
import numpy as np
import jax
import jax.numpy as jnp
from jax.experimental import pallas as pl
from jax.experimental.pallas import tpu as pltpu


def _round_up(n, m):
    return ((n + m - 1) // m) * m


# ----------------------------- Pallas kernel -------------------------------
def _fm_kernel(x_ref, v_ref, v2_ref, cs1_ref, cs2_ref, bias_ref, o_ref):
    """FM second-order term + bias add, one batch tile per grid step.

    grid = (Bp // TM,)   (batch axis only; the D reduction is collapsed)
      x_ref   : (TM, Dp) bf16  numeric feature tile
      v_ref   : (Dp, Kp) bf16  numeric factor rows        (resident)
      v2_ref  : (Dp, Kp) bf16  precomputed v^2            (resident)
      cs1_ref : (TM, Kp) bf16  gathered categorical sum_f v[idx]
      cs2_ref : (TM, Kp) bf16  gathered categorical sum_f v[idx]^2
      bias_ref: (1, TM)  f32   precomputed first-order bias (lane-dense)
      o_ref   : (1, TM)  f32   output tile (lane-dense)
    """
    x = x_ref[...]
    # x^2 via f32 (v5e has no bf16 VALU datapath); MXU matmuls stay bf16.
    xf = x.astype(jnp.float32)
    x2 = (xf * xf).astype(jnp.bfloat16)

    s1 = jnp.dot(x, v_ref[...], preferred_element_type=jnp.float32)    # (TM,Kp)
    s2 = jnp.dot(x2, v2_ref[...], preferred_element_type=jnp.float32)  # (TM,Kp)

    s1 = s1 + cs1_ref[...].astype(jnp.float32)   # x_full   @ v
    s2 = s2 + cs2_ref[...].astype(jnp.float32)   # x_full^2 @ v^2

    fm = 0.5 * jnp.sum(s1 * s1 - s2, axis=1)     # (TM,)
    o_ref[...] = bias_ref[...] + fm[None, :]     # (1, TM) lane-dense store


def fm_pallas(x_num_p, v_num_p, v2_num_p, cat_s1_p, cat_s2_p, bias_p, *, TM):
    """Run the FM kernel on pre-padded operands.

    x_num_p  : (Bp, Dp) bf16   v_num_p/v2_num_p : (Dp, Kp) bf16
    cat_s1_p : (Bp, Kp) bf16   cat_s2_p         : (Bp, Kp) bf16
    bias_p   : (1, Bp)  f32    returns          : (1, Bp)  f32
    """
    Bp, Dp = x_num_p.shape
    Kp = v_num_p.shape[1]
    assert Bp % TM == 0 and Dp % 128 == 0 and Kp % 128 == 0, (Bp, TM, Dp, Kp)
    grid_i = Bp // TM

    # Collapsed-reduction VMEM footprint (double-buffered inputs).
    vmem_bytes = (2 * TM * Dp * 2          # x tile
                  + 2 * 2 * Dp * Kp * 2    # v, v^2
                  + 2 * 2 * TM * Kp * 2    # cat_s1, cat_s2
                  + 4 * 2 * TM * 4)        # bias + out
    # TODO(synk): add a D-reduction grid fallback if Dp ever grows past VMEM.
    assert vmem_bytes < 24 * 1024 * 1024, f"Dp too large for collapsed K axis: {vmem_bytes}"

    cost = pl.CostEstimate(
        flops=4 * Bp * Dp * Kp,                           # two (Bp,Dp)@(Dp,Kp)
        transcendentals=0,
        bytes_accessed=(Bp * Dp * 2 + 2 * Dp * Kp * 2
                        + 2 * Bp * Kp * 2 + Bp * 4 + Bp * 4),
    )

    return pl.pallas_call(
        _fm_kernel,
        out_shape=jax.ShapeDtypeStruct((1, Bp), jnp.float32),
        grid_spec=pltpu.PrefetchScalarGridSpec(
            num_scalar_prefetch=0,
            grid=(grid_i,),
            in_specs=[
                pl.BlockSpec((TM, Dp), lambda i: (i, 0)),   # x tile
                pl.BlockSpec((Dp, Kp), lambda i: (0, 0)),   # v      (resident)
                pl.BlockSpec((Dp, Kp), lambda i: (0, 0)),   # v^2    (resident)
                pl.BlockSpec((TM, Kp), lambda i: (i, 0)),   # cat_s1
                pl.BlockSpec((TM, Kp), lambda i: (i, 0)),   # cat_s2
                pl.BlockSpec((1, TM), lambda i: (0, i)),    # bias (lane-dense)
            ],
            out_specs=pl.BlockSpec((1, TM), lambda i: (0, i)),
        ),
        compiler_params=pltpu.CompilerParams(
            dimension_semantics=("parallel",)),
        cost_estimate=cost,
    )(x_num_p, v_num_p, v2_num_p, cat_s1_p, cat_s2_p, bias_p)


# ----------------------------- model (params + glue) -----------------------
def init_fm_params(key, num_features, cat_features_size, emb_dim):
    n_num = len(num_features)
    sizes = list(cat_features_size.values())
    input_dim = n_num + sum(sizes)
    k_gb, k_nb, k_v, k_cat = jax.random.split(key, 4)
    params = {
        # torch.rand -> uniform [0, 1)
        "global_bias": jax.random.uniform(k_gb, (1,), jnp.float32),
        "num_bias": jax.random.uniform(k_nb, (n_num,), jnp.float32),
        # nn.init.normal_(m.v, 0, 0.01)
        "v": 0.01 * jax.random.normal(k_v, (input_dim, emb_dim), jnp.float32),
        # nn.Embedding(feature_size, 1), normal(0, 0.01)
        "cat_bias": [
            0.01 * jax.random.normal(k, (sz, 1), jnp.float32)
            for k, sz in zip(jax.random.split(k_cat, len(sizes)), sizes)
        ],
    }
    return params


def prepare_fm_params(params, num_features, cat_features_size):
    """One-time padding / bf16 casting of the factor matrix and its square."""
    n_num = len(num_features)
    sizes = list(cat_features_size.values())
    K = params["v"].shape[1]

    Dp = _round_up(max(n_num, 128), 128)        # padded numeric contraction dim
    Kp = _round_up(max(K, 128), 128)            # padded factor dim

    v = params["v"].astype(jnp.float32)
    v_num = v[:n_num]                            # (n_num, K)
    v_cat = v[n_num:]                            # (total_cat, K)

    pad_d, pad_k = Dp - n_num, Kp - K
    v_num_p = jnp.pad(v_num.astype(jnp.bfloat16), ((0, pad_d), (0, pad_k)))
    v2_num_p = jnp.pad((v_num * v_num).astype(jnp.bfloat16),
                       ((0, pad_d), (0, pad_k)))
    v_cat_p = jnp.pad(v_cat, ((0, 0), (0, pad_k)))           # f32 (gather source)

    offsets = jnp.asarray(
        np.concatenate([[0], np.cumsum(sizes)[:-1]]), jnp.int32)
    return {"v_num_p": v_num_p, "v2_num_p": v2_num_p, "v_cat_p": v_cat_p,
            "offsets": offsets, "Dp": Dp, "Kp": Kp}


def fm_forward(params, prep, x, num_features, cat_features_size):
    """x: int32 tensor (B, len(num_features) + len(cat_features_size)).
    Returns float32 tensor (B, 1), matching FM.forward."""
    n_num = len(num_features)
    sizes = list(cat_features_size.values())
    B = x.shape[0]
    Dp, Kp = prep["Dp"], prep["Kp"]

    x_num = x[:, :n_num].astype(jnp.float32)                 # (B, n_num)
    x_cat = x[:, n_num:].astype(jnp.int32)                   # (B, n_cat)

    # ---- first-order bias term (small gathers / dot) ----
    num_bias = x_num @ params["num_bias"]                    # (B,)
    cat_bias = sum(params["cat_bias"][i][x_cat[:, i], 0]
                   for i in range(len(sizes)))               # (B,)
    bias_term = params["global_bias"][0] + num_bias + cat_bias

    # ---- second-order categorical contribution: gather-sum over rows of v.
    # One-hot columns of x are 0/1, so their contribution to x@v is
    # sum_f v[off_f + idx_f] and to x^2 @ v^2 it is sum_f v[off_f + idx_f]^2.
    flat_idx = x_cat + prep["offsets"][None, :]              # (B, n_cat)
    v_rows = jnp.take(prep["v_cat_p"], flat_idx, axis=0)     # (B, n_cat, Kp) f32
    cat_s1 = jnp.sum(v_rows, axis=1)                         # (B, Kp)
    cat_s2 = jnp.sum(v_rows * v_rows, axis=1)                # (B, Kp)
    # TODO(synk): fuse this row gather into the kernel (scalar-prefetch indices
    # in SMEM + resident v_cat in VMEM) to drop the (B, Kp) HBM round-trip.

    # ---- batch tiling: pad the batch UP to the tile we want ----
    # TM=256 fills v6e/v7x MXU rows; TM=128 for smaller batches keeps >=2
    # blocks available (v7x megacore) without excessive padding.
    TM = 256 if B >= 512 else 128
    Bp = _round_up(B, TM)
    pad_b = Bp - B

    x_num_p = jnp.pad(x_num.astype(jnp.bfloat16),
                      ((0, pad_b), (0, Dp - n_num)))
    cs1_p = jnp.pad(cat_s1.astype(jnp.bfloat16), ((0, pad_b), (0, 0)))
    cs2_p = jnp.pad(cat_s2.astype(jnp.bfloat16), ((0, pad_b), (0, 0)))
    bias_p = jnp.pad(bias_term.astype(jnp.float32),
                     ((0, pad_b),)).reshape(1, Bp)

    out = fm_pallas(x_num_p, prep["v_num_p"], prep["v2_num_p"],
                    cs1_p, cs2_p, bias_p, TM=TM)
    return out[0, :B][:, None]


def fm_forward_ref(params, x, num_features, cat_features_size):
    """Pure-JAX f32 reference (dense one-hot, matches the PyTorch module)."""
    n_num = len(num_features)
    sizes = list(cat_features_size.values())
    total_cat = sum(sizes)
    B = x.shape[0]
    x_num = x[:, :n_num].astype(jnp.float32)
    x_cat = x[:, n_num:].astype(jnp.int32)
    global_bias = jnp.broadcast_to(params["global_bias"][None, :], (B, 1))
    num_bias = x_num * params["num_bias"][None, :]
    cat_bias = jnp.concatenate(
        [params["cat_bias"][i][x_cat[:, i]] for i in range(len(sizes))], axis=-1)
    bias_term = jnp.sum(
        jnp.concatenate([global_bias, num_bias, cat_bias], axis=-1), axis=-1)
    offsets = jnp.asarray(np.concatenate([[0], np.cumsum(sizes)[:-1]]), jnp.int32)
    cat_onehot = jax.nn.one_hot(
        x_cat + offsets[None, :], total_cat, dtype=jnp.float32).sum(axis=1)
    x_fm = jnp.concatenate([x_num, cat_onehot], axis=1)
    v = params["v"]
    sq_of_sum = jnp.square(x_fm @ v)
    sum_of_sq = jnp.square(x_fm) @ jnp.square(v)
    y = bias_term + 0.5 * jnp.sum(sq_of_sum - sum_of_sq, axis=1)
    return y[:, None]


# ----------------------------- main -----------------------------------------
def _run_case(seed, batch, num_features, cat_features_size, emb_dim):
    key = jax.random.PRNGKey(seed)
    k_params, k_num, k_cat = jax.random.split(key, 3)
    params = init_fm_params(k_params, num_features, cat_features_size, emb_dim)
    prep = prepare_fm_params(params, num_features, cat_features_size)

    sizes = list(cat_features_size.values())
    x_num = jax.random.randint(
        k_num, (batch, len(num_features)), 0, 10, jnp.int32)
    cat_cols = [
        jax.random.randint(kk, (batch, 1), 0, sz, jnp.int32)
        for kk, sz in zip(jax.random.split(k_cat, len(sizes)), sizes)
    ]
    x = jnp.concatenate([x_num] + cat_cols, axis=1)

    y = fm_forward(params, prep, x, num_features, cat_features_size)
    y = jax.block_until_ready(y)
    y_ref = fm_forward_ref(params, x, num_features, cat_features_size)
    np.testing.assert_allclose(np.asarray(y), np.asarray(y_ref),
                               rtol=2e-2, atol=2e-2)


if __name__ == "__main__":
    # Case 1: small configuration (single batch tile, minimal padding).
    _run_case(
        seed=0, batch=4,
        num_features=["num_0", "num_1"],
        cat_features_size={"cat_a": 5, "cat_b": 7, "cat_c": 4},
        emb_dim=8,
    )
    # Case 2: wider numeric block (Dp = 384, collapsed reduction axis).
    _run_case(
        seed=0, batch=20,
        num_features=[f"num_{i}" for i in range(300)],
        cat_features_size={"cat_a": 11, "cat_b": 6},
        emb_dim=8,
    )
    # Case 3: batch larger than one tile (grid_i > 1, lane-dense output blocks).
    _run_case(
        seed=0, batch=300,
        num_features=[f"num_{i}" for i in range(50)],
        cat_features_size={"cat_a": 13, "cat_b": 9, "cat_c": 20},
        emb_dim=16,
    )
    print("KERNEL_OK")
</pallas_src>

<mosaic_0001>
module attributes {stable_mosaic.version = 11 : i64} {
  func.func @_fm_kernel(%arg0: i32, %arg1: memref<128x128xbf16, #tpu.memory_space<vmem>>, %arg2: memref<128x128xbf16, #tpu.memory_space<vmem>>, %arg3: memref<128x128xbf16, #tpu.memory_space<vmem>>, %arg4: memref<128x128xbf16, #tpu.memory_space<vmem>>, %arg5: memref<128x128xbf16, #tpu.memory_space<vmem>>, %arg6: memref<1x128xf32, #tpu.memory_space<vmem>>, %arg7: memref<1x128xf32, #tpu.memory_space<vmem>>) attributes {dimension_semantics = [#tpu.dimension_semantics<parallel>], iteration_bounds = array<i64: 1>, scalar_prefetch = 0 : i64, scratch_operands = 0 : i64, tpu.core_type = #tpu.core_type<tc>, window_params = [{transform_indices = @transform_0, window_bounds = array<i64: 128, 128>}, {pipeline_mode = #tpu.pipeline_mode<synchronous>, transform_indices = @transform_1, window_bounds = array<i64: 128, 128>}, {pipeline_mode = #tpu.pipeline_mode<synchronous>, transform_indices = @transform_2, window_bounds = array<i64: 128, 128>}, {transform_indices = @transform_3, window_bounds = array<i64: 128, 128>}, {transform_indices = @transform_4, window_bounds = array<i64: 128, 128>}, {transform_indices = @transform_5, window_bounds = array<i64: 1, 128>}, {transform_indices = @transform_6, window_bounds = array<i64: 1, 128>}]} {
    %c0 = arith.constant 0 : index
    %c0_0 = arith.constant 0 : index
    %0 = vector.load %arg1[%c0, %c0_0] : memref<128x128xbf16, #tpu.memory_space<vmem>>, vector<128x128xbf16>
    %1 = arith.extf %0 : vector<128x128xbf16> to vector<128x128xf32>
    %2 = arith.mulf %1, %1 : vector<128x128xf32>
    %3 = arith.truncf %2 : vector<128x128xf32> to vector<128x128xbf16>
    %c0_1 = arith.constant 0 : index
    %c0_2 = arith.constant 0 : index
    %4 = vector.load %arg2[%c0_1, %c0_2] : memref<128x128xbf16, #tpu.memory_space<vmem>>, vector<128x128xbf16>
    %cst = arith.constant dense<0.000000e+00> : vector<128x128xf32>
    %5 = tpu.matmul %0, %4, %cst {dimension_numbers = #tpu.dot_dimension_numbers<[1], [0], [0], [1], [0, 0, 1, 1], [], []>} : vector<128x128xbf16>, vector<128x128xbf16>, vector<128x128xf32> -> vector<128x128xf32>
    %c0_3 = arith.constant 0 : index
    %c0_4 = arith.constant 0 : index
    %6 = vector.load %arg3[%c0_3, %c0_4] : memref<128x128xbf16, #tpu.memory_space<vmem>>, vector<128x128xbf16>
    %cst_5 = arith.constant dense<0.000000e+00> : vector<128x128xf32>
    %7 = tpu.matmul %3, %6, %cst_5 {dimension_numbers = #tpu.dot_dimension_numbers<[1], [0], [0], [1], [0, 0, 1, 1], [], []>} : vector<128x128xbf16>, vector<128x128xbf16>, vector<128x128xf32> -> vector<128x128xf32>
    %c0_6 = arith.constant 0 : index
    %c0_7 = arith.constant 0 : index
    %8 = vector.load %arg4[%c0_6, %c0_7] : memref<128x128xbf16, #tpu.memory_space<vmem>>, vector<128x128xbf16>
    %9 = arith.extf %8 : vector<128x128xbf16> to vector<128x128xf32>
    %10 = arith.addf %5, %9 : vector<128x128xf32>
    %c0_8 = arith.constant 0 : index
    %c0_9 = arith.constant 0 : index
    %11 = vector.load %arg5[%c0_8, %c0_9] : memref<128x128xbf16, #tpu.memory_space<vmem>>, vector<128x128xbf16>
    %12 = arith.extf %11 : vector<128x128xbf16> to vector<128x128xf32>
    %13 = arith.addf %7, %12 : vector<128x128xf32>
    %14 = arith.mulf %10, %10 : vector<128x128xf32>
    %15 = arith.subf %14, %13 : vector<128x128xf32>
    %cst_10 = arith.constant dense<0.000000e+00> : vector<128xf32>
    %16 = vector.multi_reduction <add>, %15, %cst_10 [1] : vector<128x128xf32> to vector<128xf32>
    %cst_11 = arith.constant 5.000000e-01 : f32
    %17 = vector.broadcast %cst_11 : f32 to vector<128xf32>
    %18 = arith.mulf %17, %16 : vector<128xf32>
    %c0_12 = arith.constant 0 : index
    %c0_13 = arith.constant 0 : index
    %19 = vector.load %arg6[%c0_12, %c0_13] : memref<1x128xf32, #tpu.memory_space<vmem>>, vector<1x128xf32>
    %20 = vector.shape_cast %18 : vector<128xf32> to vector<1x128xf32>
    %21 = arith.addf %19, %20 : vector<1x128xf32>
    %c0_14 = arith.constant 0 : index
    %c0_15 = arith.constant 0 : index
    %22 = vector.load %arg7[%c0_14, %c0_15] : memref<1x128xf32, #tpu.memory_space<vmem>>, vector<1x128xf32>
    tpu.vector_store %arg7[%c0_14, %c0_15], %21 {strides = array<i32>} : memref<1x128xf32, #tpu.memory_space<vmem>>, vector<1x128xf32>,
    return
  }
  func.func @transform_0(%arg0: i32) -> (i32, i32) {
    %c0_i32 = arith.constant 0 : i32
    %c0_i32_0 = arith.constant 0 : i32
    return %arg0, %c0_i32 : i32, i32
  }
  func.func @transform_1(%arg0: i32) -> (i32, i32) {
    %c0_i32 = arith.constant 0 : i32
    %c0_i32_0 = arith.constant 0 : i32
    %c0_i32_1 = arith.constant 0 : i32
    return %c0_i32, %c0_i32_0 : i32, i32
  }
  func.func @transform_2(%arg0: i32) -> (i32, i32) {
    %c0_i32 = arith.constant 0 : i32
    %c0_i32_0 = arith.constant 0 : i32
    %c0_i32_1 = arith.constant 0 : i32
    return %c0_i32, %c0_i32_0 : i32, i32
  }
  func.func @transform_3(%arg0: i32) -> (i32, i32) {
    %c0_i32 = arith.constant 0 : i32
    %c0_i32_0 = arith.constant 0 : i32
    return %arg0, %c0_i32 : i32, i32
  }
  func.func @transform_4(%arg0: i32) -> (i32, i32) {
    %c0_i32 = arith.constant 0 : i32
    %c0_i32_0 = arith.constant 0 : i32
    return %arg0, %c0_i32 : i32, i32
  }
  func.func @transform_5(%arg0: i32) -> (i32, i32) {
    %c0_i32 = arith.constant 0 : i32
    %c0_i32_0 = arith.constant 0 : i32
    return %c0_i32, %arg0 : i32, i32
  }
  func.func @transform_6(%arg0: i32) -> (i32, i32) {
    %c0_i32 = arith.constant 0 : i32
    %c0_i32_0 = arith.constant 0 : i32
    return %c0_i32, %arg0 : i32, i32
  }
}

</mosaic_0001>

<bundles_post_ra>
// kernel: tpu_custom_call.1
= control target key start
LH: loop header
LB: loop body
LE: loop exit
PB: predicated region body
PF: predicated region fallthrough
CT: control target
= control target key end

     0   :  { %11 = vsyncpa [#allocation3], 0  ;;  %s3121_s0 = inlined_call_operand.hbm [shape: bf16[128,128], index: 0, kind: input, shape index: {}]   ;;  %s3122_s1 = inlined_call_operand.hbm [shape: bf16[128,128], index: 1, kind: input, shape index: {}]   ;;  %s3123_s2 = inlined_call_operand.hbm [shape: bf16[128,128], index: 2, kind: input, shape index: {}]   ;;  %s3124_s3 = inlined_call_operand.hbm [shape: bf16[128,128], index: 3, kind: input, shape index: {}]   ;;  %s3125_s4 = inlined_call_operand.hbm [shape: bf16[128,128], index: 4, kind: input, shape index: {}]   ;;  %s3126_s5 = inlined_call_operand.vmem [shape: f32[1,128], index: 5, kind: input, shape index: {}]   ;;  %s3127_s6 = inlined_call_operand.hbm [shape: f32[1,128], index: 6, kind: output, shape index: {}]  }
   0x1   :  { %12 = vsyncpa [#allocation6], 0 }
   0x2   :  { %13 = vsyncpa [#allocation9], 0 }
   0x3   :  { %14 = vsyncpa [#allocation4], 0  ;;  %s2551_s21 = smov [#allocation5]   ;;  %s2552_s23 = smov [#allocation8]  }
   0x4   :  { %s32_s22 = sshll.u32 %s2551_s21, 4  ;;  %s56_s24 = sshll.u32 %s2552_s23, 4  ;;  %s33_s22 = int_to_ptr.vmem [resolvable:$true] %s32_s22  ;;  %s2596_s24 = int_to_ptr.vmem [resolvable:$true] %s56_s24 }
   0x5   :  { %s2411_s27 = scalar_lea.hbm %s3122_s1, 1024 }
   0x6   :  { %p2412_p0 = scmp.ne.s32.totalorder %s3122_s1, %s2411_s27  ;;  %p2415_p1 = scmp.lt.u32.totalorder %s2411_s27, %s3122_s1 }
   0x8   :  { %p2417_p2 = pnand %p2415_p1, %p2412_p0 }
   0xa   :  { %2420 = shalt.err (!%p2417_p2)
}
   0xb   :  { %s2421_s8 = scalar_lea.vmem %s33_s22, 1024  ;;  %p2426_p4 = scmp.lt.s32.totalorder %s33_s22, %s33_s22 }
   0xc   :  { %p2422_p3 = scmp.ne.s32.totalorder %s33_s22, %s2421_s8  ;;  %p2427_p5 = scmp.lt.s32.totalorder %s2421_s8, %s2421_s8 }
   0xe   :  { %p2428_p6 = por %p2427_p5, %p2426_p4 }
  0x10   :  { %p2429_p7 = pnand %p2428_p6, %p2422_p3 }
  0x12   :  { %2432 = shalt.err (!%p2429_p7)
}
  0x13   :  { %s2553_s9 = smov 64   ;;  %s2554_s10 = smov 4  }
  0x14   :  { %38 = dma.hbm_to_vmem [thread:$0]  %s3122_s1, 1024, %s33_s22, [#allocation6], %s2553_s9, %s2553_s9, %s2554_s10  }
  0x15   :  { %s2433_s15 = scalar_lea.hbm %s3124_s3, 1024 }
  0x16   :  { %p2434_p8 = scmp.ne.s32.totalorder %s3124_s3, %s2433_s15  ;;  %p2437_p9 = scmp.lt.u32.totalorder %s2433_s15, %s3124_s3 }
  0x18   :  { %p2439_p10 = pnand %p2437_p9, %p2434_p8 }
  0x1a   :  { %2442 = shalt.err (!%p2439_p10)
}
  0x1b   :  { %s2443_s20 = scalar_lea.vmem %s2596_s24, 1024  ;;  %p2448_p12 = scmp.lt.s32.totalorder %s2596_s24, %s2596_s24 }
  0x1c   :  { %p2444_p11 = scmp.ne.s32.totalorder %s2596_s24, %s2443_s20  ;;  %p2449_p13 = scmp.lt.s32.totalorder %s2443_s20, %s2443_s20 }
  0x1e   :  { %p2450_p0 = por %p2449_p13, %p2448_p12 }
  0x20   :  { %p2451_p1 = pnand %p2450_p0, %p2444_p11 }
  0x22   :  { %2454 = shalt.err (!%p2451_p1)
}
  0x23   :  { %62 = dma.hbm_to_vmem [thread:$0]  %s3124_s3, 1024, %s2596_s24, [#allocation9], %s2553_s9, %s2553_s9, %s2554_s10  }
  0x24   :  { %s2555_s22 = smov [#allocation2]   ;;  %s2556_s25 = smov [#allocation7]  }
  0x25   :  { %s20_s23 = sshll.u32 %s2555_s22, 4  ;;  %s44_s26 = sshll.u32 %s2556_s25, 4  ;;  %s21_s23 = int_to_ptr.vmem [resolvable:$true] %s20_s23  ;;  %s2633_s26 = int_to_ptr.vmem [resolvable:$true] %s44_s26 }
  0x26   :  { %s2455_s29 = scalar_lea.hbm %s3121_s0, 1024 }
  0x27   :  { %p2456_p2 = scmp.ne.s32.totalorder %s3121_s0, %s2455_s29  ;;  %p2459_p3 = scmp.lt.u32.totalorder %s2455_s29, %s3121_s0 }
  0x29   :  { %p2461_p4 = pnand %p2459_p3, %p2456_p2 }
  0x2b   :  { %2464 = shalt.err (!%p2461_p4)
}
  0x2c   :  { %s2465_s3 = scalar_lea.vmem %s21_s23, 1024  ;;  %p2470_p6 = scmp.lt.s32.totalorder %s21_s23, %s21_s23 }
  0x2d   :  { %p2466_p5 = scmp.ne.s32.totalorder %s21_s23, %s2465_s3  ;;  %p2471_p7 = scmp.lt.s32.totalorder %s2465_s3, %s2465_s3 }
  0x2f   :  { %p2472_p8 = por %p2471_p7, %p2470_p6 }
  0x31   :  { %p2473_p9 = pnand %p2472_p8, %p2466_p5 }
  0x33   :  { %2476 = shalt.err (!%p2473_p9)
}
  0x34   :  { %26 = dma.hbm_to_vmem [thread:$0]  %s3121_s0, 1024, %s21_s23, [#allocation3], %s2553_s9, %s2553_s9, %s2554_s10  }
  0x35   :  { %s2477_s15 = scalar_lea.hbm %s3123_s2, 1024 }
  0x36   :  { %p2478_p10 = scmp.ne.s32.totalorder %s3123_s2, %s2477_s15  ;;  %p2481_p11 = scmp.lt.u32.totalorder %s2477_s15, %s3123_s2 }
  0x38   :  { %p2483_p12 = pnand %p2481_p11, %p2478_p10 }
  0x3a   :  { %2486 = shalt.err (!%p2483_p12)
}
  0x3b   :  { %s2487_s20 = scalar_lea.vmem %s2633_s26, 1024  ;;  %p2492_p0 = scmp.lt.s32.totalorder %s2633_s26, %s2633_s26 }
  0x3c   :  { %p2488_p13 = scmp.ne.s32.totalorder %s2633_s26, %s2487_s20  ;;  %p2493_p1 = scmp.lt.s32.totalorder %s2487_s20, %s2487_s20 }
  0x3e   :  { %p2494_p2 = por %p2493_p1, %p2492_p0 }
  0x40   :  { %p2495_p3 = pnand %p2494_p2, %p2488_p13 }
  0x42   :  { %2498 = shalt.err (!%p2495_p3)
}
  0x43   :  { %50 = dma.hbm_to_vmem [thread:$0]  %s3123_s2, 1024, %s2633_s26, [#allocation6], %s2553_s9, %s2553_s9, %s2554_s10  }
  0x44   :  { %s2557_s21 = smov [#allocation10]   ;;  %s2499_s27 = scalar_lea.hbm %s3125_s4, 1024 }
  0x45   :  { %s68_s22 = sshll.u32 %s2557_s21, 4  ;;  %p2500_p4 = scmp.ne.s32.totalorder %s3125_s4, %s2499_s27  ;;  %s69_s22 = int_to_ptr.vmem [resolvable:$true] %s68_s22 }
  0x46   :  { %p2503_p5 = scmp.lt.u32.totalorder %s2499_s27, %s3125_s4 }
  0x48   :  { %p2505_p6 = pnand %p2503_p5, %p2500_p4 }
  0x4a   :  { %2508 = shalt.err (!%p2505_p6)
}
  0x4b   :  { %s2509_s8 = scalar_lea.vmem %s69_s22, 1024  ;;  %p2514_p8 = scmp.lt.s32.totalorder %s69_s22, %s69_s22 }
  0x4c   :  { %p2510_p7 = scmp.ne.s32.totalorder %s69_s22, %s2509_s8  ;;  %p2515_p9 = scmp.lt.s32.totalorder %s2509_s8, %s2509_s8 }
  0x4e   :  { %p2516_p10 = por %p2515_p9, %p2514_p8 }
  0x50   :  { %p2517_p11 = pnand %p2516_p10, %p2510_p7 }
  0x52   :  { %2520 = shalt.err (!%p2517_p11)
}
  0x53   :  { %74 = dma.hbm_to_vmem [thread:$0]  %s3125_s4, 1024, %s69_s22, [#allocation9], %s2553_s9, %s2553_s9, %s2554_s10  }
  0x54   :  { %2543 = dma.done.wait [#allocation3], 1024  }
  0x55   :  { %2544 = vsyncadd [#allocation3], 4294966272 }
  0x56   :  { %2545 = dma.done.wait [#allocation6], 2048  }
  0x57   :  { %2546 = vsyncadd [#allocation6], 4294965248 }
  0x58   :  { %2547 = dma.done.wait [#allocation9], 2048  }
  0x59   :  { %2548 = vsyncadd [#allocation9], 4294965248  ;;  %v2379_v0 = vld [vmem:[#allocation5] sm:$0xff]   ;;  %v2381_v2 = vld [vmem:[#allocation5 + $0x8] sm:$0xff]   ;;  %vm2035_vm0 = vcmask 130112   ;;  %vm2042_vm1 = vcmask 195712  }
  0x5a   :  { %v2380_v1 = vld [vmem:[#allocation7] sm:$0xff]   ;;  %2303 = vmatprep.subr.bf16.mxu0 %v2379_v0  ;;  %v2382_v3 = vld [vmem:[#allocation7 + $0x8] sm:$0xff]   ;;  %v2383_v4 = vld [vmem:[#allocation5 + $0x10] sm:$0xff]   ;;  %vm2049_vm2 = vcmask 261312   ;;  %vm2056_vm3 = vcmask 326912   ;;  %vm2063_vm4 = vcmask 392512  }
  0x5b   :  { %2335 = vmatprep.subr.bf16.mxu1 %v2380_v1  ;;  %2304 = vmatpush3.bf16.msra.mxu0 %v2379_v0  ;;  %v2384_v5 = vld [vmem:[#allocation7 + $0x10] sm:$0xff]   ;;  %v2385_v6 = vld [vmem:[#allocation5 + $0x18] sm:$0xff]   ;;  %v2387_v8 = vld [vmem:[#allocation5 + $0x20] sm:$0xff]   ;;  %vm2070_vm5 = vcmask 458112   ;;  %vm2077_vm6 = vcmask 523712   ;;  %vm2084_vm7 = vcmask 589312  }
  0x5c   :  { %2336 = vmatpush3.bf16.msra.mxu1 %v2380_v1  ;;  %2305 = vmatprep.subr.bf16.mxu0 %v2381_v2  ;;  %v2386_v7 = vld [vmem:[#allocation7 + $0x18] sm:$0xff]   ;;  %v2388_v9 = vld [vmem:[#allocation7 + $0x20] sm:$0xff]   ;;  %v2389_v10 = vld [vmem:[#allocation5 + $0x28] sm:$0xff]   ;;  %vm2091_vm8 = vcmask 654912   ;;  %vm2098_vm9 = vcmask 720512   ;;  %vm2105_vm10 = vcmask 786112  }
  0x5d   :  { %2337 = vmatprep.subr.bf16.mxu1 %v2382_v3  ;;  %v93_v11 = vld [vmem:[#allocation2] sm:$0xff]   ;;  %v2390_v12 = vld [vmem:[#allocation7 + $0x28] sm:$0xff]   ;;  %v2391_v17 = vld [vmem:[#allocation5 + $0x30] sm:$0xff]   ;;  %vm2112_vm11 = vcmask 851712   ;;  %vm2119_vm12 = vcmask 917312   ;;  %vm2126_vm13 = vcmask 982912  }
  0x5e   :  { %v109_v13 = vunpack.c.l.bf16 %v93_v11  ;;  %v110_v14 = vunpack.c.h.bf16 %v93_v11  ;;  %2319 = vmatprep.mubr.bf16.mxu0 %v93_v11  ;;  %v95_v18 = vld [vmem:[#allocation2 + $0x8] sm:$0xff]   ;;  %v2392_v19 = vld [vmem:[#allocation7 + $0x30] sm:$0xff]   ;;  %v2393_v24 = vld [vmem:[#allocation5 + $0x38] sm:$0xff]   ;;  %vm2133_vm14 = vcmask 1048512   ;;  %s2560_s10 = smov [#allocation11]  }
  0x5f   :  { %2306 = vmatpush3.bf16.msra.mxu0 %v2381_v2  ;;  %v97_v21 = vld [vmem:[#allocation2 + $0x10] sm:$0xff]   ;;  %v111_v22 = vunpack.c.l.bf16 %v95_v18  ;;  %v112_v23 = vunpack.c.h.bf16 %v95_v18  ;;  %v2394_v27 = vld [vmem:[#allocation7 + $0x38] sm:$0xff]   ;;  %v101_v33 = vld [vmem:[#allocation2 + $0x20] sm:$0xff]   ;;  %s2158_s11 = sshll.u32 %s2560_s10, 4  ;;  %s2159_s11 = int_to_ptr.vmem [resolvable:$true] %s2158_s11 }
  0x60   :  { %2338 = vmatpush3.bf16.msra.mxu1 %v2382_v3  ;;  %2307 = vmatprep.subr.bf16.mxu0 %v2383_v4  ;;  %v125_v15 = vmul.f32 %v109_v13, %v109_v13  ;;  %v126_v16 = vmul.f32 %v110_v14, %v110_v14  ;;  %v113_v25 = vunpack.c.l.bf16 %v97_v21  ;;  %v114_v26 = vunpack.c.h.bf16 %v97_v21  ;;  %v99_v30 = vld [vmem:[#allocation2 + $0x18] sm:$0xff]   ;;  %v103_v42 = vld [vmem:[#allocation2 + $0x28] sm:$0xff]   ;;  %v105_v45 = vld [vmem:[#allocation2 + $0x30] sm:$0xff]   ;;  %s2521_s3 = scalar_lea.vmem %s2159_s11, 16  ;;  %s2525_s24 = scalar_lea.vmem %s2159_s11, 32 }
  0x61   :  { %2339 = vmatprep.subr.bf16.mxu1 %v2384_v5  ;;  %v127_v28 = vmul.f32 %v111_v22, %v111_v22  ;;  %v128_v29 = vmul.f32 %v112_v23, %v112_v23  ;;  %v115_v35 = vunpack.c.l.bf16 %v99_v30  ;;  %v116_v36 = vunpack.c.h.bf16 %v99_v30  ;;  %v107_v54 = vld [vmem:[#allocation2 + $0x38] sm:$0xff]   ;;  %v2257_v0 = vld [vmem:[#allocation8 + $0x8] sm:$0xff]   ;;  %v2194_v2 = vld [vmem:[#allocation8] sm:$0xff]   ;;  %p2522_p12 = scmp.ne.s32.totalorder %s2159_s11, %s2521_s3  ;;  %p2526_p13 = scmp.lt.s32.totalorder %s2159_s11, %s2159_s11 }
  0x62   :  { %v141_v20 = vpack.c.bf16 %v126_v16, %v125_v15  ;;  %v129_v31 = vmul.f32 %v113_v25, %v113_v25  ;;  %v130_v32 = vmul.f32 %v114_v26, %v114_v26  ;;  %v117_v38 = vunpack.c.l.bf16 %v101_v33  ;;  %v2264_v1 = vld [vmem:[#allocation10 + $0x8] sm:$0xff]   ;;  %v2226_v3 = vld [vmem:[#allocation10] sm:$0xff]   ;;  %v2259_v15 = vld [vmem:[#allocation8 + $0x18] sm:$0xff]   ;;  %p2527_p0 = scmp.lt.s32.totalorder %s2525_s24, %s2521_s3 }
  0x63   :  { %2308 = vmatpush3.bf16.msra.mxu0 %v2383_v4  ;;  %v142_v34 = vpack.c.bf16 %v128_v29, %v127_v28  ;;  %v118_v39 = vunpack.c.h.bf16 %v101_v33  ;;  %v131_v40 = vmul.f32 %v115_v35, %v115_v35  ;;  %v132_v41 = vmul.f32 %v116_v36, %v116_v36 }
  0x64   :  { %2340 = vmatpush3.bf16.msra.mxu1 %v2384_v5  ;;  %2309 = vmatprep.subr.bf16.mxu0 %v2385_v6  ;;  %v143_v37 = vpack.c.bf16 %v130_v32, %v129_v31  ;;  %v133_v43 = vmul.f32 %v117_v38, %v117_v38  ;;  %v119_v47 = vunpack.c.l.bf16 %v103_v42  ;;  %v120_v48 = vunpack.c.h.bf16 %v103_v42  ;;  %v2265_v32 = vld [vmem:[#allocation10 + $0x10] sm:$0xff]   ;;  %p2528_p1 = por %p2527_p0, %p2526_p13 }
  0x65   :  { %2341 = vmatprep.subr.bf16.mxu1 %v2386_v7  ;;  %2351 = vmatprep.mubr.bf16.mxu1 %v141_v20  ;;  %v134_v44 = vmul.f32 %v118_v39, %v118_v39  ;;  %v144_v46 = vpack.c.bf16 %v132_v41, %v131_v40  ;;  %v121_v50 = vunpack.c.l.bf16 %v105_v45  ;;  %v122_v51 = vunpack.c.h.bf16 %v105_v45 }
  0x66   :  { %v135_v52 = vmul.f32 %v119_v47, %v119_v47  ;;  %v136_v53 = vmul.f32 %v120_v48, %v120_v48  ;;  %v123_v58 = vunpack.c.l.bf16 %v107_v54  ;;  %v124_v59 = vunpack.c.h.bf16 %v107_v54  ;;  %p2529_p2 = pnand %p2528_p1, %p2522_p12 }
  0x67   :  { %2310 = vmatpush3.bf16.msra.mxu0 %v2385_v6  ;;  %v145_v49 = vpack.c.bf16 %v134_v44, %v133_v43  ;;  %v137_v55 = vmul.f32 %v121_v50, %v121_v50  ;;  %v138_v56 = vmul.f32 %v122_v51, %v122_v51  ;;  %v2199_v4 = vunpack.c.l.bf16 %v2257_v0 }
  0x68   :  { %2342 = vmatpush3.bf16.msra.mxu1 %v2386_v7  ;;  %2311 = vmatprep.subr.bf16.mxu0 %v2387_v8  ;;  %v146_v57 = vpack.c.bf16 %v136_v53, %v135_v52  ;;  %v139_v61 = vmul.f32 %v123_v58, %v123_v58  ;;  %v140_v62 = vmul.f32 %v124_v59, %v124_v59  ;;  %v2231_v5 = vunpack.c.l.bf16 %v2264_v1 }
  0x69   :  { %2343 = vmatprep.subr.bf16.mxu1 %v2388_v9  ;;  %v147_v60 = vpack.c.bf16 %v138_v56, %v137_v55  ;;  %v2195_v6 = vunpack.c.l.bf16 %v2194_v2  ;;  %v2227_v7 = vunpack.c.l.bf16 %v2226_v3  ;;  %v2232_v14 = vunpack.c.h.bf16 %v2264_v1  ;;  %v2261_v1 = vld [vmem:[#allocation8 + $0x28] sm:$0xff]  }
  0x6a   :  { %v148_v63 = vpack.c.bf16 %v140_v62, %v139_v61  ;;  %v2228_v20 = vunpack.c.h.bf16 %v2226_v3  ;;  %v2207_v31 = vunpack.c.l.bf16 %v2259_v15  ;;  %v2208_v41 = vunpack.c.h.bf16 %v2259_v15 }
  0x6b   :  { %2312 = vmatpush3.bf16.msra.mxu0 %v2387_v8  ;;  %v2200_v8 = vunpack.c.h.bf16 %v2257_v0  ;;  %v2235_v43 = vunpack.c.l.bf16 %v2265_v32  ;;  %v2236_v51 = vunpack.c.h.bf16 %v2265_v32 }
  0x6c   :  { %2344 = vmatpush3.bf16.msra.mxu1 %v2388_v9  ;;  %2313 = vmatprep.subr.bf16.mxu0 %v2389_v10 }
  0x6d   :  { %2345 = vmatprep.subr.bf16.mxu1 %v2390_v12 }
  0x6f   :  { %2314 = vmatpush3.bf16.msra.mxu0 %v2389_v10  ;;  %v2196_v10 = vunpack.c.h.bf16 %v2194_v2 }
  0x70   :  { %2346 = vmatpush3.bf16.msra.mxu1 %v2390_v12  ;;  %2315 = vmatprep.subr.bf16.mxu0 %v2391_v17 }
  0x71   :  { %2347 = vmatprep.subr.bf16.mxu1 %v2392_v19 }
  0x73   :  { %2316 = vmatpush3.bf16.msra.mxu0 %v2391_v17 }
  0x74   :  { %2348 = vmatpush3.bf16.msra.mxu1 %v2392_v19  ;;  %2317 = vmatprep.subr.bf16.mxu0 %v2393_v24 }
  0x75   :  { %2349 = vmatprep.subr.bf16.mxu1 %v2394_v27 }
  0x77   :  { %2318 = vmatpush3.bf16.msra.mxu0 %v2393_v24 }
  0x78   :  { %2350 = vmatpush3.bf16.msra.mxu1 %v2394_v27  ;;  %v2258_v27 = vld [vmem:[#allocation8 + $0x10] sm:$0xff]  }
  0x79   :  { %v2203_v40 = vunpack.c.l.bf16 %v2258_v27 }
  0x7a   :  { %2320 = vmatmul.mubr.bf16.vlgmr.msra.gmra.mrb[0].mxu0 %v95_v18 }
  0x7b   :  { %2352 = vmatmul.mubr.bf16.vlgmr.msra.gmra.mrb[0].mxu1 %v142_v34  ;;  %2323 = vmatprep.mubr.bf16.mxu0 %v97_v21  ;;  %v2266_v21 = vld [vmem:[#allocation10 + $0x18] sm:$0xff]  }
  0x7c   :  { %2355 = vmatprep.mubr.bf16.mxu1 %v143_v37  ;;  %v2239_v36 = vunpack.c.l.bf16 %v2266_v21 }
  0x82   :  { %2324 = vmatmul.mubr.bf16.gmra.mrb[4].mxu0 %v99_v30 }
  0x83   :  { %2356 = vmatmul.mubr.bf16.gmra.mrb[4].mxu1 %v144_v46  ;;  %2327 = vmatprep.mubr.bf16.mxu0 %v101_v33  ;;  %v2240_v46 = vunpack.c.h.bf16 %v2266_v21 }
  0x84   :  { %2359 = vmatprep.mubr.bf16.mxu1 %v145_v49 }
  0x8a   :  { %2328 = vmatmul.mubr.bf16.gmra.mrb[8].mxu0 %v103_v42 }
  0x8b   :  { %2360 = vmatmul.mubr.bf16.gmra.mrb[8].mxu1 %v146_v57  ;;  %2331 = vmatprep.mubr.bf16.mxu0 %v105_v45  ;;  %v2204_v45 = vunpack.c.h.bf16 %v2258_v27 }
  0x8c   :  { %2363 = vmatprep.mubr.bf16.mxu1 %v147_v60 }
  0x92   :  { %2332 = vmatmul.mubr.bf16.gmra.mrb[12].mxu0 %v107_v54 }
  0x93   :  { %2364 = vmatmul.mubr.bf16.gmra.mrb[12].mxu1 %v148_v63 }
 0x14d   :  { %v2321_v9 = vpop.f32.mrb[0].mxu0 }
 0x14e   :  { %v352_v11 = vadd.f32 %v2321_v9, %v2199_v4  ;;  %v2353_v12 = vpop.f32.mrb[0].mxu1  ;;  %v343_v13 = vpop.f32.mrb[1].mxu0 }
 0x14f   :  { %v529_v16 = vadd.f32 %v2353_v12, %v2231_v5  ;;  %v344_v17 = vadd.f32 %v2195_v6, %v343_v13  ;;  %v520_v18 = vpop.f32.mrb[1].mxu1  ;;  %v2322_v19 = vpop.f32.mrb[2].mxu0  ;;  %v2215_v5 = vunpack.c.l.bf16 %v2261_v1  ;;  %v2260_v6 = vld [vmem:[#allocation8 + $0x20] sm:$0xff]  }
 0x150   :  { %v585_v22 = vmul.f32 %v352_v11, %v352_v11  ;;  %v521_v23 = vadd.f32 %v2227_v7, %v520_v18  ;;  %v355_v24 = vadd.f32 %v2322_v19, %v2200_v8  ;;  %v2354_v25 = vpop.f32.mrb[2].mxu1  ;;  %v346_v26 = vpop.f32.mrb[3].mxu0  ;;  %v2268_v7 = vld [vmem:[#allocation10 + $0x28] sm:$0xff]   ;;  %v2211_v9 = vunpack.c.l.bf16 %v2260_v6  ;;  %v2267_v11 = vld [vmem:[#allocation10 + $0x20] sm:$0xff]  }
 0x151   :  { %v583_v28 = vmul.f32 %v344_v17, %v344_v17  ;;  %v347_v29 = vadd.f32 %v2196_v10, %v346_v26  ;;  %v523_v30 = vpop.f32.mrb[3].mxu1  ;;  %v532_v34 = vadd.f32 %v2354_v25, %v2232_v14  ;;  %v2247_v10 = vunpack.c.l.bf16 %v2268_v7 }
 0x152   :  { %v586_v33 = vmul.f32 %v355_v24, %v355_v24  ;;  %v601_v35 = vsub.f32 %v585_v22, %v529_v16  ;;  %v524_v38 = vadd.f32 %v2228_v20, %v523_v30  ;;  %v2216_v14 = vunpack.c.h.bf16 %v2261_v1 }
 0x153   :  { %v584_v37 = vmul.f32 %v347_v29, %v347_v29  ;;  %v599_v39 = vsub.f32 %v583_v28, %v521_v23  ;;  %v2243_v15 = vunpack.c.l.bf16 %v2267_v11  ;;  %v2248_v17 = vunpack.c.h.bf16 %v2268_v7 }
 0x154   :  { %619 = vadd.xlane.f32.xlu1 %v601_v35  ;;  %v602_v42 = vsub.f32 %v586_v33, %v532_v34  ;;  %v2212_v19 = vunpack.c.h.bf16 %v2260_v6  ;;  %v2244_v23 = vunpack.c.h.bf16 %v2267_v11 }
 0x155   :  { %v2325_v44 = vpop.f32.mrb[4].mxu0  ;;  %615 = vadd.xlane.f32.xlu0 %v599_v39  ;;  %v600_v47 = vsub.f32 %v584_v37, %v524_v38 }
 0x156   :  { %v368_v48 = vadd.f32 %v2325_v44, %v2207_v31  ;;  %v359_v49 = vpop.f32.mrb[5].mxu0  ;;  %v2357_v50 = vpop.f32.mrb[4].mxu1 }
 0x157   :  { %v360_v52 = vadd.f32 %v2203_v40, %v359_v49  ;;  %v2326_v53 = vpop.f32.mrb[6].mxu0  ;;  %v545_v54 = vadd.f32 %v2357_v50, %v2239_v36  ;;  %v536_v55 = vpop.f32.mrb[5].mxu1  ;;  %v2263_v36 = vld [vmem:[#allocation8 + $0x38] sm:$0xff]   ;;  %v2262_v40 = vld [vmem:[#allocation8 + $0x30] sm:$0xff]  }
 0x158   :  { %v589_v56 = vmul.f32 %v368_v48, %v368_v48  ;;  %v371_v57 = vadd.f32 %v2326_v53, %v2208_v41  ;;  %621 = vadd.xlane.f32.xlu1 %v602_v42  ;;  %v537_v58 = vadd.f32 %v2235_v43, %v536_v55  ;;  %v362_v59 = vpop.f32.mrb[7].mxu0  ;;  %v2358_v60 = vpop.f32.mrb[6].mxu1  ;;  %v2223_v39 = vunpack.c.l.bf16 %v2263_v36  ;;  %v2270_v42 = vld [vmem:[#allocation10 + $0x38] sm:$0xff]  }
 0x159   :  { %v587_v61 = vmul.f32 %v360_v52, %v360_v52  ;;  %v363_v62 = vadd.f32 %v2204_v45, %v362_v59  ;;  %v548_v63 = vadd.f32 %v2358_v60, %v2240_v46  ;;  %617 = vadd.xlane.f32.xlu0 %v600_v47  ;;  %v539_v0 = vpop.f32.mrb[7].mxu1  ;;  %v2219_v45 = vunpack.c.l.bf16 %v2262_v40  ;;  %v2269_v47 = vld [vmem:[#allocation10 + $0x30] sm:$0xff]  }
 0x15a   :  { %v590_v2 = vmul.f32 %v371_v57, %v371_v57  ;;  %v540_v3 = vadd.f32 %v2236_v51, %v539_v0  ;;  %v605_v4 = vsub.f32 %v589_v56, %v545_v54  ;;  %v2255_v46 = vunpack.c.l.bf16 %v2270_v42 }
 0x15b   :  { %v588_v8 = vmul.f32 %v363_v62, %v363_v62  ;;  %v603_v12 = vsub.f32 %v587_v61, %v537_v58  ;;  %v2224_v49 = vunpack.c.h.bf16 %v2263_v36  ;;  %v2251_v51 = vunpack.c.l.bf16 %v2269_v47 }
 0x15c   :  { %v606_v13 = vsub.f32 %v590_v2, %v548_v63  ;;  %v2220_v53 = vunpack.c.h.bf16 %v2262_v40  ;;  %v2256_v54 = vunpack.c.h.bf16 %v2270_v42  ;;  %v2252_v59 = vunpack.c.h.bf16 %v2269_v47 }
 0x15d   :  { %627 = vadd.xlane.f32.xlu0 %v605_v4  ;;  %v2329_v16 = vpop.f32.mrb[8].mxu0  ;;  %v604_v18 = vsub.f32 %v588_v8, %v540_v3 }
 0x15e   :  { %v384_v20 = vadd.f32 %v2329_v16, %v2215_v5  ;;  %629 = vadd.xlane.f32.xlu1 %v606_v13  ;;  %v375_v21 = vpop.f32.mrb[9].mxu0  ;;  %v2361_v22 = vpop.f32.mrb[8].mxu1  ;;  %v2558_v16 = vmov 0  }
 0x15f   :  { %v376_v24 = vadd.f32 %v2211_v9, %v375_v21  ;;  %v2330_v25 = vpop.f32.mrb[10].mxu0  ;;  %v561_v26 = vadd.f32 %v2361_v22, %v2247_v10  ;;  %v552_v27 = vpop.f32.mrb[9].mxu1  ;;  %2377 = vset.pattern.permute.xlu1 %v2558_v16  ;;  %2378 = vset.pattern.permute.xlu0 %v2558_v16 }
 0x160   :  { %v593_v28 = vmul.f32 %v384_v20, %v384_v20  ;;  %v387_v29 = vadd.f32 %v2330_v25, %v2216_v14  ;;  %v553_v30 = vadd.f32 %v2243_v15, %v552_v27  ;;  %v2362_v31 = vpop.f32.mrb[10].mxu1  ;;  %v378_v32 = vpop.f32.mrb[11].mxu0 }
 0x161   :  { %v591_v33 = vmul.f32 %v376_v24, %v376_v24  ;;  %623 = vadd.xlane.f32.xlu0 %v603_v12  ;;  %v564_v34 = vadd.f32 %v2362_v31, %v2248_v17  ;;  %v379_v35 = vadd.f32 %v2212_v19, %v378_v32  ;;  %v555_v37 = vpop.f32.mrb[11].mxu1  ;;  %v680_v17 = vlaneseq }
 0x162   :  { %v594_v38 = vmul.f32 %v387_v29, %v387_v29  ;;  %625 = vadd.xlane.f32.xlu1 %v604_v18  ;;  %v556_v41 = vadd.f32 %v2244_v23, %v555_v37  ;;  %v609_v43 = vsub.f32 %v593_v28, %v561_v26  ;;  %v2559_v18 = vmov 1966171168  }
 0x163   :  { %v592_v44 = vmul.f32 %v379_v35, %v379_v35  ;;  %v607_v48 = vsub.f32 %v591_v33, %v553_v30  ;;  %v1197_v19 = vunpack.c.l.s4 %v2559_v18  ;;  %v2686_v20 = vshrl.u32 %v680_v17, 7 }
 0x164   :  { %v610_v50 = vsub.f32 %v594_v38, %v564_v34 }
 0x165   :  { %v2333_v52 = vpop.f32.mrb[12].mxu0  ;;  %635 = vadd.xlane.f32.xlu0 %v609_v43  ;;  %v608_v55 = vsub.f32 %v592_v44, %v556_v41  ;;  %v1198_v21 = vunpack.c.0.s8 %v1197_v19  ;;  %v2689_v22 = vsub.s32 0, %v2686_v20  ;;  %v2692_v23 = vsub.s32 1, %v2686_v20 }
 0x166   :  { %v400_v56 = vadd.f32 %v2333_v52, %v2223_v39  ;;  %v391_v57 = vpop.f32.mrb[13].mxu0  ;;  %v2365_v58 = vpop.f32.mrb[12].mxu1  ;;  %637 = vadd.xlane.f32.xlu1 %v610_v50  ;;  %v2695_v24 = vsub.s32 2, %v2686_v20  ;;  %v2698_v25 = vsub.s32 3, %v2686_v20  ;;  %v2701_v27 = vsub.s32 4, %v2686_v20 }
 0x167   :  { %v392_v60 = vadd.f32 %v2219_v45, %v391_v57  ;;  %v2334_v61 = vpop.f32.mrb[14].mxu0  ;;  %v577_v62 = vadd.f32 %v2365_v58, %v2255_v46  ;;  %v568_v63 = vpop.f32.mrb[13].mxu1  ;;  %v2704_v28 = vsub.s32 5, %v2686_v20  ;;  %v2707_v29 = vsub.s32 6, %v2686_v20 }
 0x168   :  { %v597_v0 = vmul.f32 %v400_v56, %v400_v56  ;;  %v403_v1 = vadd.f32 %v2334_v61, %v2224_v49  ;;  %v394_v2 = vpop.f32.mrb[15].mxu0  ;;  %v569_v3 = vadd.f32 %v2251_v51, %v568_v63  ;;  %v2366_v4 = vpop.f32.mrb[14].mxu1  ;;  %v2710_v30 = vsub.s32 7, %v2686_v20 }
 0x169   :  { %v595_v5 = vmul.f32 %v392_v60, %v392_v60  ;;  %v395_v6 = vadd.f32 %v2220_v53, %v394_v2  ;;  %v580_v7 = vadd.f32 %v2366_v4, %v2256_v54  ;;  %v571_v8 = vpop.f32.mrb[15].mxu1  ;;  %631 = vadd.xlane.f32.xlu0 %v607_v48  ;;  %v2713_v34 = vsub.s32 %v1198_v21, %v2686_v20 }
 0x16a   :  { %v598_v9 = vmul.f32 %v403_v1, %v403_v1  ;;  %v572_v10 = vadd.f32 %v2252_v59, %v571_v8  ;;  %633 = vadd.xlane.f32.xlu1 %v608_v55  ;;  %v613_v11 = vsub.f32 %v597_v0, %v577_v62 }
 0x16b   :  { %v596_v12 = vmul.f32 %v395_v6, %v395_v6  ;;  %v611_v13 = vsub.f32 %v595_v5, %v569_v3 }
 0x16c   :  { %v614_v14 = vsub.f32 %v598_v9, %v580_v7 }
 0x16d   :  { %v612_v15 = vsub.f32 %v596_v12, %v572_v10  ;;  %639 = vadd.xlane.f32.xlu0 %v611_v13 }
 0x16f   :  { %641 = vadd.xlane.f32.xlu1 %v612_v15 }
 0x171   :  { %643 = vadd.xlane.f32.xlu0 %v613_v11 }
 0x173   :  { %645 = vadd.xlane.f32.xlu1 %v614_v14 }
 0x1e1   :  { %v620_v26 = vpop.xlane.xlu1 %619 }
 0x1e2   :  { %v649_v31 = vmul.f32 0.5, %v620_v26  ;;  %v616_v32 = vpop.xlane.xlu0 %615 }
 0x1e3   :  { %v647_v33 = vmul.f32 0.5, %v616_v32 }
 0x1e4   :  { %v747_v35 = vrot.slane %v649_v31, %v2689_v22  ;;  %v751_v36 = vrot.slane %v649_v31, %v2692_v23  ;;  %v755_v37 = vrot.slane %v649_v31, %v2695_v24  ;;  %v759_v38 = vrot.slane %v649_v31, %v2698_v25 }
 0x1e5   :  { %v622_v39 = vpop.xlane.xlu1 %621  ;;  %v763_v40 = vrot.slane %v649_v31, %v2701_v27  ;;  %v767_v41 = vrot.slane %v649_v31, %v2704_v28  ;;  %v771_v42 = vrot.slane %v649_v31, %v2707_v29  ;;  %v775_v43 = vrot.slane %v649_v31, %v2710_v30 }
 0x1e6   :  { %v650_v44 = vmul.f32 0.5, %v622_v39  ;;  %v618_v45 = vpop.xlane.xlu0 %617  ;;  %v1290_v46 = vcombine.low %v747_v35, %v751_v36  ;;  %v1291_v47 = vcombine.low %v755_v37, %v759_v38  ;;  %v683_v48 = vrot.slane %v647_v33, %v2689_v22 }
 0x1e7   :  { %v2724_v49 = vmul.f32 0.5, %v618_v45  ;;  %v1292_v50 = vcombine.low %v763_v40, %v767_v41  ;;  %v1293_v51 = vcombine.low %v771_v42, %v775_v43  ;;  %v687_v52 = vrot.slane %v647_v33, %v2692_v23 }
 0x1e8   :  { %v1300_v53 = vrot.slane %v1290_v46, %v2713_v34  ;;  %v1307_v54 = vrot.slane %v1291_v47, %v2713_v34  ;;  %v691_v55 = vrot.slane %v647_v33, %v2695_v24  ;;  %v695_v56 = vrot.slane %v647_v33, %v2698_v25 }
 0x1e9   :  { %v1314_v57 = vrot.slane %v1292_v50, %v2713_v34  ;;  %v1321_v58 = vrot.slane %v1293_v51, %v2713_v34  ;;  %v699_v59 = vrot.slane %v647_v33, %v2701_v27  ;;  %v703_v60 = vrot.slane %v647_v33, %v2704_v28 }
 0x1ea   :  { %v628_v61 = vpop.xlane.xlu0 %627  ;;  %v1322_v62 = vcombine.low %v1300_v53, %v1307_v54  ;;  %v707_v63 = vrot.slane %v647_v33, %v2707_v29  ;;  %v711_v0 = vrot.slane %v647_v33, %v2710_v30  ;;  %v1192_v1 = vcombine.low %v683_v48, %v687_v52 }
 0x1eb   :  { %v2737_v2 = vmul.f32 0.5, %v628_v61  ;;  %v630_v3 = vpop.xlane.xlu1 %629  ;;  %v1323_v4 = vcombine.low %v1314_v57, %v1321_v58  ;;  %v1193_v5 = vcombine.low %v691_v55, %v695_v56  ;;  %v1194_v6 = vcombine.low %v699_v59, %v703_v60 }
 0x1ec   :  { %v2739_v7 = vmul.f32 0.5, %v630_v3  ;;  %v1330_v8 = vrot.slane %v1322_v62, %v2713_v34  ;;  %v1195_v9 = vcombine.low %v707_v63, %v711_v0  ;;  %v1202_v10 = vrot.slane %v1192_v1, %v2713_v34 }
 0x1ed   :  { %v1337_v11 = vrot.slane %v1323_v4, %v2713_v34  ;;  %v1209_v12 = vrot.slane %v1193_v5, %v2713_v34  ;;  %v1216_v13 = vrot.slane %v1194_v6, %v2713_v34  ;;  %v779_v14 = vrot.slane %v650_v44, %v2689_v22 }
 0x1ee   :  { %v624_v15 = vpop.xlane.xlu0 %623  ;;  %v1223_v16 = vrot.slane %v1195_v9, %v2713_v34  ;;  %v783_v18 = vrot.slane %v650_v44, %v2692_v23  ;;  %v787_v19 = vrot.slane %v650_v44, %v2695_v24  ;;  %v791_v21 = vrot.slane %v650_v44, %v2698_v25 }
 0x1ef   :  { %v2751_v26 = vmul.f32 0.5, %v624_v15  ;;  %v626_v31 = vpop.xlane.xlu1 %625  ;;  %v1338_v32 = vcombine.low %v1330_v8, %v1337_v11  ;;  %v1224_v33 = vcombine.low %v1202_v10, %v1209_v12  ;;  %v795_v35 = vrot.slane %v650_v44, %v2701_v27 }
 0x1f0   :  { %v2754_v36 = vmul.f32 0.5, %v626_v31  ;;  %v1225_v37 = vcombine.low %v1216_v13, %v1223_v16  ;;  %v799_v38 = vrot.slane %v650_v44, %v2704_v28  ;;  %v803_v39 = vrot.slane %v650_v44, %v2707_v29 }
 0x1f1   :  { %1983 = vperm.xlu1 %2377, %v1338_v32   ;;  %v1232_v40 = vrot.slane %v1224_v33, %v2713_v34  ;;  %v807_v41 = vrot.slane %v650_v44, %v2710_v30  ;;  %v1339_v42 = vcombine.low %v779_v14, %v783_v18  ;;  %v1340_v43 = vcombine.low %v787_v19, %v791_v21 }
 0x1f2   :  { %v1239_v45 = vrot.slane %v1225_v37, %v2713_v34  ;;  %v1341_v46 = vcombine.low %v795_v35, %v799_v38  ;;  %v636_v47 = vpop.xlane.xlu0 %635  ;;  %v715_v48 = vrot.slane %v2724_v49, %v2689_v22  ;;  %v719_v50 = vrot.slane %v2724_v49, %v2692_v23 }
 0x1f3   :  { %v1342_v51 = vcombine.low %v803_v39, %v807_v41  ;;  %v1349_v52 = vrot.slane %v1339_v42, %v2713_v34  ;;  %v1356_v53 = vrot.slane %v1340_v43, %v2713_v34  ;;  %v638_v54 = vpop.xlane.xlu1 %637  ;;  %v2767_v55 = vmul.f32 0.5, %v636_v47 }
 0x1f4   :  { %v1240_v44 = vcombine.low %v1232_v40, %v1239_v45  ;;  %v1363_v56 = vrot.slane %v1341_v46, %v2713_v34  ;;  %v2770_v57 = vmul.f32 0.5, %v638_v54  ;;  %v723_v58 = vrot.slane %v2724_v49, %v2695_v24 }
 0x1f5   :  { %v1370_v59 = vrot.slane %v1342_v51, %v2713_v34  ;;  %v1371_v60 = vcombine.low %v1349_v52, %v1356_v53  ;;  %v727_v61 = vrot.slane %v2724_v49, %v2698_v25  ;;  %v731_v62 = vrot.slane %v2724_v49, %v2701_v27 }
 0x1f6   :  { %1977 = vperm.xlu0 %2378, %v1240_v44   ;;  %v735_v63 = vrot.slane %v2724_v49, %v2704_v28  ;;  %v739_v0 = vrot.slane %v2724_v49, %v2707_v29  ;;  %v743_v1 = vrot.slane %v2724_v49, %v2710_v30  ;;  %v1241_v3 = vcombine.low %v715_v48, %v719_v50  ;;  %v632_v4 = vpop.xlane.xlu0 %631 }
 0x1f7   :  { %v1372_v5 = vcombine.low %v1363_v56, %v1370_v59  ;;  %v1379_v6 = vrot.slane %v1371_v60, %v2713_v34  ;;  %v634_v8 = vpop.xlane.xlu1 %633  ;;  %v1242_v9 = vcombine.low %v723_v58, %v727_v61  ;;  %v2786_v10 = vmul.f32 0.5, %v632_v4 }
 0x1f8   :  { %v2788_v11 = vmul.f32 0.5, %v634_v8  ;;  %v1243_v12 = vcombine.low %v731_v62, %v735_v63  ;;  %v1244_v13 = vcombine.low %v739_v0, %v743_v1  ;;  %v1251_v14 = vrot.slane %v1241_v3, %v2713_v34 }
 0x1f9   :  { %v1386_v15 = vrot.slane %v1372_v5, %v2713_v34  ;;  %v1258_v16 = vrot.slane %v1242_v9, %v2713_v34  ;;  %v875_v49 = vrot.slane %v2737_v2, %v2689_v22  ;;  %v879_v18 = vrot.slane %v2737_v2, %v2692_v23 }
 0x1fa   :  { %v1265_v19 = vrot.slane %v1243_v12, %v2713_v34  ;;  %v1272_v21 = vrot.slane %v1244_v13, %v2713_v34  ;;  %v883_v31 = vrot.slane %v2737_v2, %v2695_v24  ;;  %v887_v32 = vrot.slane %v2737_v2, %v2698_v25  ;;  %v640_v50 = vpop.xlane.xlu0 %639 }
 0x1fb   :  { %v1387_v33 = vcombine.low %v1379_v6, %v1386_v15  ;;  %v1273_v35 = vcombine.low %v1251_v14, %v1258_v16  ;;  %v891_v37 = vrot.slane %v2737_v2, %v2701_v27  ;;  %v895_v38 = vrot.slane %v2737_v2, %v2704_v28 }
 0x1fc   :  { %v1274_v39 = vcombine.low %v1265_v19, %v1272_v21  ;;  %v642_v40 = vpop.xlane.xlu1 %641  ;;  %v899_v41 = vrot.slane %v2737_v2, %v2707_v29  ;;  %v903_v42 = vrot.slane %v2737_v2, %v2710_v30  ;;  %v1486_v43 = vcombine.low %v875_v49, %v879_v18 }
 0x1fd   :  { %1986 = vperm.xlu1 %2377, %v1387_v33   ;;  %v1281_v45 = vrot.slane %v1273_v35, %v2713_v34  ;;  %v2812_v46 = vmul.f32 0.5, %v642_v40  ;;  %v1487_v47 = vcombine.low %v883_v31, %v887_v32  ;;  %v1488_v48 = vcombine.low %v891_v37, %v895_v38 }
 0x1fe   :  { %v1288_v51 = vrot.slane %v1274_v39, %v2713_v34  ;;  %v1489_v52 = vcombine.low %v899_v41, %v903_v42  ;;  %v1496_v53 = vrot.slane %v1486_v43, %v2713_v34  ;;  %v2816_v54 = vmul.f32 0.5, %v640_v50  ;;  %v644_v33 = vpop.xlane.xlu0 %643 }
 0x1ff   :  { %v1503_v44 = vrot.slane %v1487_v47, %v2713_v34  ;;  %v1510_v2 = vrot.slane %v1488_v48, %v2713_v34  ;;  %v811_v56 = vrot.slane %v2751_v26, %v2689_v22  ;;  %v815_v58 = vrot.slane %v2751_v26, %v2692_v23 }
 0x200   :  { %v1289_v59 = vcombine.low %v1281_v45, %v1288_v51  ;;  %v1517_v60 = vrot.slane %v1489_v52, %v2713_v34  ;;  %v646_v61 = vpop.xlane.xlu1 %645  ;;  %v819_v62 = vrot.slane %v2751_v26, %v2695_v24  ;;  %v823_v63 = vrot.slane %v2751_v26, %v2698_v25 }
 0x201   :  { %v1518_v0 = vcombine.low %v1496_v53, %v1503_v44  ;;  %v2829_v1 = vmul.f32 0.5, %v646_v61  ;;  %v827_v3 = vrot.slane %v2751_v26, %v2701_v27  ;;  %v831_v4 = vrot.slane %v2751_v26, %v2704_v28 }
 0x202   :  { %1980 = vperm.xlu1 %2377, %v1289_v59   ;;  %v1519_v5 = vcombine.low %v1510_v2, %v1517_v60  ;;  %v835_v6 = vrot.slane %v2751_v26, %v2707_v29  ;;  %v839_v8 = vrot.slane %v2751_v26, %v2710_v30  ;;  %v1388_v9 = vcombine.low %v811_v56, %v815_v58 }
 0x203   :  { %v1526_v12 = vrot.slane %v1518_v0, %v2713_v34  ;;  %v1389_v13 = vcombine.low %v819_v62, %v823_v63  ;;  %v1390_v14 = vcombine.low %v827_v3, %v831_v4  ;;  %v1035_v15 = vrot.slane %v2770_v57, %v2689_v22 }
 0x204   :  { %v1533_v16 = vrot.slane %v1519_v5, %v2713_v34  ;;  %v1391_v49 = vcombine.low %v835_v6, %v839_v8  ;;  %v1398_v18 = vrot.slane %v1388_v9, %v2713_v34  ;;  %v1039_v19 = vrot.slane %v2770_v57, %v2692_v23 }
 0x205   :  { %v1405_v21 = vrot.slane %v1389_v13, %v2713_v34  ;;  %v1412_v26 = vrot.slane %v1390_v14, %v2713_v34  ;;  %v1043_v31 = vrot.slane %v2770_v57, %v2695_v24  ;;  %v1047_v32 = vrot.slane %v2770_v57, %v2698_v25 }
 0x206   :  { %v1534_v35 = vcombine.low %v1526_v12, %v1533_v16  ;;  %v1419_v37 = vrot.slane %v1391_v49, %v2713_v34  ;;  %v1051_v38 = vrot.slane %v2770_v57, %v2701_v27  ;;  %v1055_v39 = vrot.slane %v2770_v57, %v2704_v28 }
 0x207   :  { %v1420_v40 = vcombine.low %v1398_v18, %v1405_v21  ;;  %v1059_v41 = vrot.slane %v2770_v57, %v2707_v29  ;;  %v1063_v42 = vrot.slane %v2770_v57, %v2710_v30  ;;  %v1731_v43 = vcombine.low %v1035_v15, %v1039_v19 }
 0x208   :  { %1995 = vperm.xlu1 %2377, %v1534_v35   ;;  %v1421_v45 = vcombine.low %v1412_v26, %v1419_v37  ;;  %v1732_v47 = vcombine.low %v1043_v31, %v1047_v32  ;;  %v1733_v48 = vcombine.low %v1051_v38, %v1055_v39  ;;  %v2861_v50 = vmul.f32 0.5, %v644_v33 }
 0x209   :  { %v1428_v51 = vrot.slane %v1420_v40, %v2713_v34  ;;  %v1734_v52 = vcombine.low %v1059_v41, %v1063_v42  ;;  %v1741_v53 = vrot.slane %v1731_v43, %v2713_v34  ;;  %v907_v44 = vrot.slane %v2739_v7, %v2689_v22 }
 0x20a   :  { %v1435_v2 = vrot.slane %v1421_v45, %v2713_v34  ;;  %v1748_v56 = vrot.slane %v1732_v47, %v2713_v34  ;;  %v1755_v57 = vrot.slane %v1733_v48, %v2713_v34  ;;  %v911_v58 = vrot.slane %v2739_v7, %v2692_v23 }
 0x20b   :  { %v1762_v59 = vrot.slane %v1734_v52, %v2713_v34  ;;  %v915_v60 = vrot.slane %v2739_v7, %v2695_v24  ;;  %v919_v61 = vrot.slane %v2739_v7, %v2698_v25  ;;  %v923_v62 = vrot.slane %v2739_v7, %v2701_v27 }
 0x20c   :  { %v1436_v63 = vcombine.low %v1428_v51, %v1435_v2  ;;  %v1763_v0 = vcombine.low %v1741_v53, %v1748_v56  ;;  %v927_v3 = vrot.slane %v2739_v7, %v2704_v28  ;;  %v931_v4 = vrot.slane %v2739_v7, %v2707_v29 }
 0x20d   :  { %v1764_v5 = vcombine.low %v1755_v57, %v1762_v59  ;;  %v935_v6 = vrot.slane %v2739_v7, %v2710_v30  ;;  %v1535_v8 = vcombine.low %v907_v44, %v911_v58  ;;  %v1536_v9 = vcombine.low %v915_v60, %v919_v61 }
 0x20e   :  { %1989 = vperm.xlu1 %2377, %v1436_v63   ;;  %v1771_v12 = vrot.slane %v1763_v0, %v2713_v34  ;;  %v1537_v13 = vcombine.low %v923_v62, %v927_v3  ;;  %v971_v14 = vrot.slane %v2788_v11, %v2689_v22  ;;  %v975_v15 = vrot.slane %v2788_v11, %v2692_v23 }
 0x20f   :  { %v1778_v16 = vrot.slane %v1764_v5, %v2713_v34  ;;  %v1538_v49 = vcombine.low %v931_v4, %v935_v6  ;;  %v1545_v18 = vrot.slane %v1535_v8, %v2713_v34  ;;  %v1552_v19 = vrot.slane %v1536_v9, %v2713_v34 }
 0x210   :  { %v1559_v7 = vrot.slane %v1537_v13, %v2713_v34  ;;  %v979_v21 = vrot.slane %v2788_v11, %v2695_v24  ;;  %v983_v26 = vrot.slane %v2788_v11, %v2698_v25  ;;  %v987_v31 = vrot.slane %v2788_v11, %v2701_v27 }
 0x211   :  { %v1779_v32 = vcombine.low %v1771_v12, %v1778_v16  ;;  %v1566_v33 = vrot.slane %v1538_v49, %v2713_v34  ;;  %v1567_v35 = vcombine.low %v1545_v18, %v1552_v19  ;;  %v991_v37 = vrot.slane %v2788_v11, %v2704_v28 }
 0x212   :  { %v995_v38 = vrot.slane %v2788_v11, %v2707_v29  ;;  %v999_v39 = vrot.slane %v2788_v11, %v2710_v30  ;;  %v1633_v40 = vcombine.low %v971_v14, %v975_v15  ;;  %v1634_v41 = vcombine.low %v979_v21, %v983_v26 }
 0x213   :  { %2010 = vperm.xlu0 %2378, %v1779_v32   ;;  %v1568_v42 = vcombine.low %v1559_v7, %v1566_v33  ;;  %v1575_v43 = vrot.slane %v1567_v35, %v2713_v34  ;;  %v1635_v45 = vcombine.low %v987_v31, %v991_v37  ;;  %v843_v47 = vrot.slane %v2754_v36, %v2689_v22 }
 0x214   :  { %v1636_v48 = vcombine.low %v995_v38, %v999_v39  ;;  %v1643_v51 = vrot.slane %v1633_v40, %v2713_v34  ;;  %v1650_v52 = vrot.slane %v1634_v41, %v2713_v34  ;;  %v847_v53 = vrot.slane %v2754_v36, %v2692_v23 }
 0x215   :  { %v1582_v11 = vrot.slane %v1568_v42, %v2713_v34  ;;  %v1657_v44 = vrot.slane %v1635_v45, %v2713_v34  ;;  %v851_v2 = vrot.slane %v2754_v36, %v2695_v24  ;;  %v855_v56 = vrot.slane %v2754_v36, %v2698_v25 }
 0x216   :  { %v1664_v57 = vrot.slane %v1636_v48, %v2713_v34  ;;  %v1665_v58 = vcombine.low %v1643_v51, %v1650_v52  ;;  %v859_v59 = vrot.slane %v2754_v36, %v2701_v27  ;;  %v863_v60 = vrot.slane %v2754_v36, %v2704_v28 }
 0x217   :  { %v1583_v61 = vcombine.low %v1575_v43, %v1582_v11  ;;  %v867_v62 = vrot.slane %v2754_v36, %v2707_v29  ;;  %v871_v63 = vrot.slane %v2754_v36, %v2710_v30  ;;  %v1437_v0 = vcombine.low %v843_v47, %v847_v53 }
 0x218   :  { %v1666_v3 = vcombine.low %v1657_v44, %v1664_v57  ;;  %v1673_v4 = vrot.slane %v1665_v58, %v2713_v34  ;;  %v1438_v5 = vcombine.low %v851_v2, %v855_v56  ;;  %v1439_v6 = vcombine.low %v859_v59, %v863_v60 }
 0x219   :  { %1998 = vperm.xlu1 %2377, %v1583_v61   ;;  %v1440_v8 = vcombine.low %v867_v62, %v871_v63  ;;  %v1447_v9 = vrot.slane %v1437_v0, %v2713_v34  ;;  %v1099_v12 = vrot.slane %v2812_v46, %v2689_v22  ;;  %v1103_v13 = vrot.slane %v2812_v46, %v2692_v23 }
 0x21a   :  { %v1680_v14 = vrot.slane %v1666_v3, %v2713_v34  ;;  %v1454_v36 = vrot.slane %v1438_v5, %v2713_v34  ;;  %v1461_v15 = vrot.slane %v1439_v6, %v2713_v34  ;;  %v1107_v16 = vrot.slane %v2812_v46, %v2695_v24 }
 0x21b   :  { %v1468_v49 = vrot.slane %v1440_v8, %v2713_v34  ;;  %v1111_v18 = vrot.slane %v2812_v46, %v2698_v25  ;;  %v1115_v19 = vrot.slane %v2812_v46, %v2701_v27  ;;  %v1119_v7 = vrot.slane %v2812_v46, %v2704_v28 }
 0x21c   :  { %v1681_v21 = vcombine.low %v1673_v4, %v1680_v14  ;;  %v1469_v26 = vcombine.low %v1447_v9, %v1454_v36  ;;  %v1123_v31 = vrot.slane %v2812_v46, %v2707_v29  ;;  %v1127_v32 = vrot.slane %v2812_v46, %v2710_v30 }
 0x21d   :  { %v1470_v33 = vcombine.low %v1461_v15, %v1468_v49  ;;  %v1829_v35 = vcombine.low %v1099_v12, %v1103_v13  ;;  %v1830_v37 = vcombine.low %v1107_v16, %v1111_v18  ;;  %v1831_v38 = vcombine.low %v1115_v19, %v1119_v7 }
 0x21e   :  { %2004 = vperm.xlu0 %2378, %v1681_v21   ;;  %v1477_v39 = vrot.slane %v1469_v26, %v2713_v34  ;;  %v1832_v40 = vcombine.low %v1123_v31, %v1127_v32  ;;  %v1003_v41 = vrot.slane %v2767_v55, %v2689_v22  ;;  %v1007_v42 = vrot.slane %v2767_v55, %v2692_v23 }
 0x21f   :  { %v1484_v43 = vrot.slane %v1470_v33, %v2713_v34  ;;  %v1839_v45 = vrot.slane %v1829_v35, %v2713_v34  ;;  %v1846_v46 = vrot.slane %v1830_v37, %v2713_v34  ;;  %v1853_v47 = vrot.slane %v1831_v38, %v2713_v34 }
 0x220   :  { %v1860_v48 = vrot.slane %v1832_v40, %v2713_v34  ;;  %v1011_v51 = vrot.slane %v2767_v55, %v2695_v24  ;;  %v1015_v52 = vrot.slane %v2767_v55, %v2698_v25  ;;  %v1019_v53 = vrot.slane %v2767_v55, %v2701_v27 }
 0x221   :  { %v1485_v11 = vcombine.low %v1477_v39, %v1484_v43  ;;  %v1861_v44 = vcombine.low %v1839_v45, %v1846_v46  ;;  %v1023_v2 = vrot.slane %v2767_v55, %v2704_v28  ;;  %v1027_v56 = vrot.slane %v2767_v55, %v2707_v29 }
 0x222   :  { %v1862_v57 = vcombine.low %v1853_v47, %v1860_v48  ;;  %v1031_v58 = vrot.slane %v2767_v55, %v2710_v30  ;;  %v1682_v59 = vcombine.low %v1003_v41, %v1007_v42  ;;  %v1683_v60 = vcombine.low %v1011_v51, %v1015_v52 }
 0x223   :  { %1992 = vperm.xlu1 %2377, %v1485_v11   ;;  %v1869_v61 = vrot.slane %v1861_v44, %v2713_v34  ;;  %v1684_v62 = vcombine.low %v1019_v53, %v1023_v2  ;;  %v1163_v63 = vrot.slane %v2829_v1, %v2689_v22  ;;  %v1167_v0 = vrot.slane %v2829_v1, %v2692_v23 }
 0x224   :  { %v1876_v3 = vrot.slane %v1862_v57, %v2713_v34  ;;  %v1685_v4 = vcombine.low %v1027_v56, %v1031_v58  ;;  %v1692_v5 = vrot.slane %v1682_v59, %v2713_v34  ;;  %v1699_v6 = vrot.slane %v1683_v60, %v2713_v34 }
 0x225   :  { %v1706_v55 = vrot.slane %v1684_v62, %v2713_v34  ;;  %v1171_v8 = vrot.slane %v2829_v1, %v2695_v24  ;;  %v1175_v9 = vrot.slane %v2829_v1, %v2698_v25  ;;  %v1179_v12 = vrot.slane %v2829_v1, %v2701_v27 }
 0x226   :  { %v1877_v13 = vcombine.low %v1869_v61, %v1876_v3  ;;  %v1713_v14 = vrot.slane %v1685_v4, %v2713_v34  ;;  %v1714_v36 = vcombine.low %v1692_v5, %v1699_v6  ;;  %v1183_v15 = vrot.slane %v2829_v1, %v2704_v28 }
 0x227   :  { %v1187_v16 = vrot.slane %v2829_v1, %v2707_v29  ;;  %v1191_v49 = vrot.slane %v2829_v1, %v2710_v30  ;;  %v1927_v18 = vcombine.low %v1163_v63, %v1167_v0  ;;  %v1928_v19 = vcombine.low %v1171_v8, %v1175_v9 }
 0x228   :  { %2016 = vperm.xlu0 %2378, %v1877_v13   ;;  %v1715_v7 = vcombine.low %v1706_v55, %v1713_v14  ;;  %v1722_v21 = vrot.slane %v1714_v36, %v2713_v34  ;;  %v1929_v26 = vcombine.low %v1179_v12, %v1183_v15  ;;  %v939_v31 = vrot.slane %v2786_v10, %v2689_v22 }
 0x229   :  { %v1930_v32 = vcombine.low %v1187_v16, %v1191_v49  ;;  %v1937_v33 = vrot.slane %v1927_v18, %v2713_v34  ;;  %v1944_v35 = vrot.slane %v1928_v19, %v2713_v34  ;;  %v943_v37 = vrot.slane %v2786_v10, %v2692_v23 }
 0x22a   :  { %v1729_v1 = vrot.slane %v1715_v7, %v2713_v34  ;;  %v1951_v38 = vrot.slane %v1929_v26, %v2713_v34  ;;  %v947_v39 = vrot.slane %v2786_v10, %v2695_v24  ;;  %v951_v40 = vrot.slane %v2786_v10, %v2698_v25 }
 0x22b   :  { %v1958_v41 = vrot.slane %v1930_v32, %v2713_v34  ;;  %v1959_v42 = vcombine.low %v1937_v33, %v1944_v35  ;;  %v955_v43 = vrot.slane %v2786_v10, %v2701_v27  ;;  %v959_v45 = vrot.slane %v2786_v10, %v2704_v28 }
 0x22c   :  { %v1730_v46 = vcombine.low %v1722_v21, %v1729_v1  ;;  %v963_v47 = vrot.slane %v2786_v10, %v2707_v29  ;;  %v967_v48 = vrot.slane %v2786_v10, %v2710_v30  ;;  %v1584_v51 = vcombine.low %v939_v31, %v943_v37 }
 0x22d   :  { %v1960_v52 = vcombine.low %v1951_v38, %v1958_v41  ;;  %v1967_v53 = vrot.slane %v1959_v42, %v2713_v34  ;;  %v1585_v11 = vcombine.low %v947_v39, %v951_v40  ;;  %v1586_v44 = vcombine.low %v955_v43, %v959_v45 }
 0x22e   :  { %2007 = vperm.xlu1 %2377, %v1730_v46   ;;  %v1587_v2 = vcombine.low %v963_v47, %v967_v48  ;;  %v1594_v56 = vrot.slane %v1584_v51, %v2713_v34  ;;  %v1067_v57 = vrot.slane %v2816_v54, %v2689_v22  ;;  %v1071_v58 = vrot.slane %v2816_v54, %v2692_v23 }
 0x22f   :  { %v1974_v59 = vrot.slane %v1960_v52, %v2713_v34  ;;  %v1601_v10 = vrot.slane %v1585_v11, %v2713_v34  ;;  %v1608_v60 = vrot.slane %v1586_v44, %v2713_v34  ;;  %v1075_v61 = vrot.slane %v2816_v54, %v2695_v24 }
 0x230   :  { %v1615_v62 = vrot.slane %v1587_v2, %v2713_v34  ;;  %v1079_v63 = vrot.slane %v2816_v54, %v2698_v25  ;;  %v1083_v0 = vrot.slane %v2816_v54, %v2701_v27  ;;  %v1087_v3 = vrot.slane %v2816_v54, %v2704_v28 }
 0x231   :  { %v1975_v4 = vcombine.low %v1967_v53, %v1974_v59  ;;  %v1616_v5 = vcombine.low %v1594_v56, %v1601_v10  ;;  %v1091_v6 = vrot.slane %v2816_v54, %v2707_v29  ;;  %v1095_v55 = vrot.slane %v2816_v54, %v2710_v30 }
 0x232   :  { %v1617_v8 = vcombine.low %v1608_v60, %v1615_v62  ;;  %v1780_v9 = vcombine.low %v1067_v57, %v1071_v58  ;;  %v1781_v12 = vcombine.low %v1075_v61, %v1079_v63  ;;  %v1782_v13 = vcombine.low %v1083_v0, %v1087_v3 }
 0x233   :  { %2022 = vperm.xlu0 %2378, %v1975_v4   ;;  %v1624_v14 = vrot.slane %v1616_v5, %v2713_v34  ;;  %v1783_v36 = vcombine.low %v1091_v6, %v1095_v55  ;;  %v1131_v15 = vrot.slane %v2861_v50, %v2689_v22  ;;  %v1135_v16 = vrot.slane %v2861_v50, %v2692_v23 }
 0x234   :  { %v1631_v49 = vrot.slane %v1617_v8, %v2713_v34  ;;  %v1790_v18 = vrot.slane %v1780_v9, %v2713_v34  ;;  %v1797_v54 = vrot.slane %v1781_v12, %v2713_v34  ;;  %v1804_v19 = vrot.slane %v1782_v13, %v2713_v34 }
 0x235   :  { %v1811_v7 = vrot.slane %v1783_v36, %v2713_v34  ;;  %v1139_v21 = vrot.slane %v2861_v50, %v2695_v24  ;;  %v1143_v26 = vrot.slane %v2861_v50, %v2698_v25  ;;  %v1147_v22 = vrot.slane %v2861_v50, %v2701_v27 }
 0x236   :  { %v1632_v23 = vcombine.low %v1624_v14, %v1631_v49  ;;  %v1812_v31 = vcombine.low %v1790_v18, %v1797_v54  ;;  %v1151_v32 = vrot.slane %v2861_v50, %v2704_v28  ;;  %v1155_v33 = vrot.slane %v2861_v50, %v2707_v29 }
 0x237   :  { %v1813_v35 = vcombine.low %v1804_v19, %v1811_v7  ;;  %v1159_v37 = vrot.slane %v2861_v50, %v2710_v30  ;;  %v1878_v1 = vcombine.low %v1131_v15, %v1135_v16  ;;  %v1879_v24 = vcombine.low %v1139_v21, %v1143_v26 }
 0x238   :  { %2001 = vperm.xlu1 %2377, %v1632_v23   ;;  %v1820_v25 = vrot.slane %v1812_v31, %v2713_v34  ;;  %v1880_v38 = vcombine.low %v1147_v22, %v1151_v32  ;;  %v3070_v53 = vand.u32 127, %v680_v17 }
 0x239   :  { %v1827_v27 = vrot.slane %v1813_v35, %v2713_v34  ;;  %v1881_v39 = vcombine.low %v1155_v33, %v1159_v37  ;;  %v1888_v40 = vrot.slane %v1878_v1, %v2713_v34  ;;  %v1895_v28 = vrot.slane %v1879_v24, %v2713_v34 }
 0x23a   :  { %v1902_v41 = vrot.slane %v1880_v38, %v2713_v34  ;;  %v2030_v11 = vadd.s32 4294967288, %v3070_v53  ;;  %v2037_v56 = vadd.s32 4294967280, %v3070_v53  ;;  %v2028_v57 = vsub.s32 %v3070_v53, %v2686_v20 }
 0x23b   :  { %v1828_v29 = vcombine.low %v1820_v25, %v1827_v27  ;;  %v1909_v42 = vrot.slane %v1881_v39, %v2713_v34  ;;  %v1910_v43 = vcombine.low %v1888_v40, %v1895_v28  ;;  %v2051_v10 = vadd.s32 4294967264, %v3070_v53 }
 0x23c   :  { %v2033_v2 = vsub.s32 %v2030_v11, %v2686_v20  ;;  %v2044_v60 = vadd.s32 4294967272, %v3070_v53  ;;  %v2058_v17 = vadd.s32 4294967256, %v3070_v53  ;;  %v2040_v62 = vsub.s32 %v2037_v56, %v2686_v20 }
 0x23d   :  { %2013 = vperm.xlu1 %2377, %v1828_v29   ;;  %v1911_v30 = vcombine.low %v1902_v41, %v1909_v42  ;;  %v1918_v50 = vrot.slane %v1910_v43, %v2713_v34  ;;  %v2054_v0 = vsub.s32 %v2051_v10, %v2686_v20  ;;  %v2065_v8 = vadd.s32 4294967248, %v3070_v53 }
 0x23e   :  { %v2047_v3 = vsub.s32 %v2044_v60, %v2686_v20  ;;  %v2061_v5 = vsub.s32 %v2058_v17, %v2686_v20  ;;  %v2072_v36 = vadd.s32 4294967240, %v3070_v53  ;;  %v2079_v49 = vadd.s32 4294967232, %v3070_v53 }
 0x23f   :  { %v1925_v45 = vrot.slane %v1911_v30, %v2713_v34  ;;  %v2068_v16 = vsub.s32 %v2065_v8, %v2686_v20  ;;  %v2086_v54 = vadd.s32 4294967224, %v3070_v53  ;;  %v2093_v21 = vadd.s32 4294967216, %v3070_v53 }
 0x240   :  { %v2075_v26 = vsub.s32 %v2072_v36, %v2686_v20  ;;  %v2100_v31 = vadd.s32 4294967208, %v3070_v53  ;;  %v2082_v32 = vsub.s32 %v2079_v49, %v2686_v20  ;;  %v2107_v37 = vadd.s32 4294967200, %v3070_v53 }
 0x241   :  { %v1926_v46 = vcombine.low %v1918_v50, %v1925_v45  ;;  %v2089_v33 = vsub.s32 %v2086_v54, %v2686_v20  ;;  %v2096_v24 = vsub.s32 %v2093_v21, %v2686_v20  ;;  %v2114_v29 = vadd.s32 4294967192, %v3070_v53 }
 0x242   :  { %v2103_v27 = vsub.s32 %v2100_v31, %v2686_v20  ;;  %v2110_v41 = vsub.s32 %v2107_v37, %v2686_v20  ;;  %v2121_v45 = vadd.s32 4294967184, %v3070_v53 }
 0x243   :  { %2019 = vperm.xlu1 %2377, %v1926_v46   ;;  %v2117_v11 = vsub.s32 %v2114_v29, %v2686_v20 }
 0x270   :  { %v1984_v47 = vpop.permute.xlu1 %1983 }
 0x271   :  { %v2041_v55 = vrot.slane %v1984_v47, %v2040_v62  ;;  %v2128_v47 = vadd.s32 4294967176, %v3070_v53 }
 0x273   :  { %v2131_v56 = vsub.s32 %v2128_v47, %v2686_v20 }
 0x275   :  { %v1978_v59 = vpop.permute.xlu0 %1977 }
 0x276   :  { %v2029_v63 = vrot.slane %v1978_v59, %v2028_v57 }
 0x27c   :  { %v1987_v48 = vpop.permute.xlu1 %1986 }
 0x27d   :  { %v2048_v13 = vrot.slane %v1987_v48, %v2047_v3 }
 0x281   :  { %v1981_v51 = vpop.permute.xlu1 %1980 }
 0x282   :  { %v2034_v61 = vrot.slane %v1981_v51, %v2033_v2  ;;  %v2124_v2 = vsub.s32 %v2121_v45, %v2686_v20 }
 0x284   :  { %v2036_v4 = vsel %vm2035_vm0, %v2034_v61, %v2029_v63 }
 0x285   :  { %v2043_v9 = vsel %vm2042_vm1, %v2041_v55, %v2036_v4 }
 0x286   :  { %v2050_v18 = vsel %vm2049_vm2, %v2048_v13, %v2043_v9 }
 0x287   :  { %v1996_v52 = vpop.permute.xlu1 %1995 }
 0x288   :  { %v2069_v23 = vrot.slane %v1996_v52, %v2068_v16 }
 0x28d   :  { %v1990_v44 = vpop.permute.xlu1 %1989 }
 0x28e   :  { %v2055_v12 = vrot.slane %v1990_v44, %v2054_v0  ;;  %v663_v0 = vld [vmem:[%s3126_s5] sm:$0x1] }
 0x290   :  { %v2057_v7 = vsel %vm2056_vm3, %v2055_v12, %v2050_v18 }
 0x292   :  { %v2011_v14 = vpop.permute.xlu0 %2010 }
 0x293   :  { %v2104_v46 = vrot.slane %v2011_v14, %v2103_v27 }
 0x298   :  { %v1999_v58 = vpop.permute.xlu1 %1998 }
 0x299   :  { %v2076_v25 = vrot.slane %v1999_v58, %v2075_v26 }
 0x29d   :  { %v2005_v35 = vpop.permute.xlu0 %2004 }
 0x29e   :  { %v2090_v40 = vrot.slane %v2005_v35, %v2089_v33 }
 0x2a2   :  { %v1993_v6 = vpop.permute.xlu1 %1992 }
 0x2a3   :  { %v2062_v15 = vrot.slane %v1993_v6, %v2061_v5 }
 0x2a5   :  { %v2064_v22 = vsel %vm2063_vm4, %v2062_v15, %v2057_v7 }
 0x2a6   :  { %v2071_v1 = vsel %vm2070_vm5, %v2069_v23, %v2064_v22 }
 0x2a7   :  { %v2078_v28 = vsel %vm2077_vm6, %v2076_v25, %v2071_v1  ;;  %v2017_v30 = vpop.permute.xlu0 %2016 }
 0x2a8   :  { %v2118_v59 = vrot.slane %v2017_v30, %v2117_v11 }
 0x2ad   :  { %v2008_v19 = vpop.permute.xlu1 %2007 }
 0x2ae   :  { %v2097_v42 = vrot.slane %v2008_v19, %v2096_v24 }
 0x2b2   :  { %v2023_v57 = vpop.permute.xlu0 %2022 }
 0x2b3   :  { %v2132_v53 = vrot.slane %v2023_v57, %v2131_v56 }
 0x2b7   :  { %v2002_v38 = vpop.permute.xlu1 %2001 }
 0x2b8   :  { %v2083_v39 = vrot.slane %v2002_v38, %v2082_v32 }
 0x2ba   :  { %v2085_v43 = vsel %vm2084_vm7, %v2083_v39, %v2078_v28 }
 0x2bb   :  { %v2092_v50 = vsel %vm2091_vm8, %v2090_v40, %v2085_v43 }
 0x2bc   :  { %v2014_v48 = vpop.permute.xlu1 %2013  ;;  %v2099_v51 = vsel %vm2098_vm9, %v2097_v42, %v2092_v50 }
 0x2bd   :  { %v2111_v52 = vrot.slane %v2014_v48, %v2110_v41  ;;  %v2106_v44 = vsel %vm2105_vm10, %v2104_v46, %v2099_v51 }
 0x2bf   :  { %v2113_v58 = vsel %vm2112_vm11, %v2111_v52, %v2106_v44 }
 0x2c0   :  { %v2120_v61 = vsel %vm2119_vm12, %v2118_v59, %v2113_v58 }
 0x2c2   :  { %v2020_v10 = vpop.permute.xlu1 %2019 }
 0x2c3   :  { %v2125_v60 = vrot.slane %v2020_v10, %v2124_v2 }
 0x2c5   :  { %v2127_v17 = vsel %vm2126_vm13, %v2125_v60, %v2120_v61 }
 0x2c6   :  { %v2134_v62 = vsel %vm2133_vm14, %v2132_v53, %v2127_v17 }
 0x2c7   :  { %v2141_v63 = vrot.slane %v2134_v62, %v2713_v34 }
 0x2c9   :  { %v2148_v20 = vrot.slane %v2141_v63, %v2713_v34 }
 0x2cb   :  { %v2150_v3 = vadd.f32 %v2148_v20, %v663_v0 }
 0x2cd   :  { %2151 = vst [vmem:[#allocation11] sm:$0x1] %v2150_v3 }
 0x2ce   :  { %2532 = shalt.err (!%p2529_p2)
}
 0x2cf   :  { %s2533_s14 = scalar_lea.hbm %s3127_s6, 16 }
 0x2d0   :  { %p2534_p3 = scmp.ne.s32.totalorder %s3127_s6, %s2533_s14  ;;  %p2537_p4 = scmp.lt.u32.totalorder %s2533_s14, %s3127_s6 }
 0x2d2   :  { %p2539_p5 = pnand %p2537_p4, %p2534_p3 }
 0x2d4   :  { %2542 = shalt.err (!%p2539_p5)
}
 0x2d5   :  { %2161 = dma.vmem_to_hbm [thread:$0]  %s2159_s11, 16, %s3127_s6, [#allocation4]  }
 0x2d6   :  { %2549 = dma.done.wait [#allocation4], 16  }
 0x2d7   :  { %2550 = vsyncadd [#allocation4], 4294967280 }
 0x2d8   :  { %2165 = vsyncpa [#allocation3], 1 }
 0x2d9   :  { %2166 = vsyncpa [#allocation6], 1 }
 0x2da   :  { %2167 = vsyncpa [#allocation9], 1 }
 0x2db   :  { %2168 = vsyncpa [#allocation4], 1 }

</bundles_post_ra>
